<compile_context>
chip_gen: v5e
topology: v5e:2x2
jax: 0.10.0
libtpu: 0.0.40
codegen_flags: <defaults>
</compile_context>

<pallas_src>
import jax
import jax.numpy as jnp
from jax.experimental import pallas as pl
from jax.experimental.pallas import tpu as pltpu


def _dc_kernel(w1m_ref, wm_ref, pred_ref, ref_ref, out_ref):
    # w1m_ref : VMEM (1, tl)   -- (1 - mask) * dc_weight   (resident over rows)
    # wm_ref  : VMEM (1, tl)   --      mask  * dc_weight   (resident over rows)
    # pred_ref: VMEM (tb, tl)
    # ref_ref : VMEM (tb, tl)
    # out_ref : VMEM (tb, tl)
    out_ref[...] = pred_ref[...] * w1m_ref[...] + ref_ref[...] * wm_ref[...]


def _choose_tiles(rows, lanes, itemsize):
    """Pick (tb, tl) block shape.

    Last dim must be a multiple of 128 or the full extent; second-to-last must
    be a multiple of 8 or the full extent.  Target ~1 MiB per data block so the
    double-buffered footprint (pred, ref, out + tiny mask rows) stays ~6 MiB —
    safe on v5e's 16 MiB and v7x's 32 MiB default scoped VMEM.
    """
    LANE = 128
    SUBLANE = 8
    MAX_LANE_TILE = 8192          # multiple of 128
    TARGET_BLOCK_BYTES = 1 << 20  # ~1 MiB per (tb, tl) block

    if lanes % LANE != 0 or lanes <= MAX_LANE_TILE:
        tl = lanes                # full extent (always layout-legal)
    else:
        tl = MAX_LANE_TILE        # large, 128-aligned lane tile

    target_rows = max(1, TARGET_BLOCK_BYTES // (tl * itemsize))
    if target_rows >= rows or rows <= SUBLANE:
        tb = rows                 # full extent
    else:
        tb = max(SUBLANE, (target_rows // SUBLANE) * SUBLANE)
    return tb, tl


def data_consistency_layer(pred_kspace, ref_kspace, mask, dc_weight):
    """Pallas implementation of DataConsistencyLayer.forward.

    pred_kspace, ref_kspace : [B, C, X, Y, 2]
    mask                    : [1, 1, X, Y, 1]
    dc_weight               : [1] parameter
    Returns [B, C, X, Y, 2].
    """
    B, C, X, Y, two = pred_kspace.shape
    assert two == 2
    dtype = pred_kspace.dtype
    R = B * C
    L = X * Y * 2

    # Flatten to the lane-dense kernel layout.
    pred2 = pred_kspace.reshape(R, L)
    ref2 = ref_kspace.reshape(R, L)

    # mask [1,1,X,Y,1] -> broadcast over complex dim -> [1, L]; fold in dc_weight.
    m = jnp.broadcast_to(mask.reshape(X, Y, 1), (X, Y, 2)).reshape(1, L).astype(dtype)
    w = dc_weight.astype(dtype).reshape(())
    w1m = (1 - m) * w   # (1 - mask) * dc_weight
    wm = m * w          #      mask  * dc_weight

    tb, tl = _choose_tiles(R, L, jnp.dtype(dtype).itemsize)
    grid = (pl.cdiv(R, tb), pl.cdiv(L, tl))

    out2 = pl.pallas_call(
        _dc_kernel,
        out_shape=jax.ShapeDtypeStruct((R, L), dtype),
        grid_spec=pltpu.PrefetchScalarGridSpec(
            num_scalar_prefetch=0,
            grid=grid,
            in_specs=[
                pl.BlockSpec((1, tl), lambda i, j: (0, j)),    # (1-m)*w (row-resident)
                pl.BlockSpec((1, tl), lambda i, j: (0, j)),    # m*w     (row-resident)
                pl.BlockSpec((tb, tl), lambda i, j: (i, j)),   # pred
                pl.BlockSpec((tb, tl), lambda i, j: (i, j)),   # ref
            ],
            out_specs=pl.BlockSpec((tb, tl), lambda i, j: (i, j)),
        ),
        compiler_params=pltpu.CompilerParams(
            dimension_semantics=("parallel", "parallel"),
        ),
    )(w1m, wm, pred2, ref2)

    return out2.reshape(B, C, X, Y, 2)


if __name__ == "__main__":
    key = jax.random.PRNGKey(0)
    k1, k2, k3 = jax.random.split(key, 3)

    B, C, X, Y = 2, 4, 16, 16
    pred_kspace = jax.random.normal(k1, (B, C, X, Y, 2), dtype=jnp.float32)
    ref_kspace = jax.random.normal(k2, (B, C, X, Y, 2), dtype=jnp.float32)
    # Binary subsampling mask, shape [1, 1, X, Y, 1]
    mask = (jax.random.uniform(k3, (1, 1, X, Y, 1)) > 0.5).astype(jnp.float32)

    # Deterministic parameter init (matches torch.ones(1)).
    dc_weight = jnp.ones((1,), dtype=jnp.float32)

    out = data_consistency_layer(pred_kspace, ref_kspace, mask, dc_weight)
    out = jax.block_until_ready(out)

    # Reference check (plain JAX, mirrors the PyTorch forward)
    expected = ((1.0 - mask) * pred_kspace + mask * ref_kspace) * dc_weight[0]
    assert out.shape == (B, C, X, Y, 2)
    assert jnp.allclose(out, expected, atol=1e-6, rtol=1e-6)

    print("KERNEL_OK")
</pallas_src>

<mosaic_0001>
module attributes {stable_mosaic.version = 11 : i64} {
  func.func @_dc_kernel(%arg0: i32, %arg1: i32, %arg2: memref<1x512xf32, #tpu.memory_space<vmem>>, %arg3: memref<1x512xf32, #tpu.memory_space<vmem>>, %arg4: memref<8x512xf32, #tpu.memory_space<vmem>>, %arg5: memref<8x512xf32, #tpu.memory_space<vmem>>, %arg6: memref<8x512xf32, #tpu.memory_space<vmem>>) attributes {dimension_semantics = [#tpu.dimension_semantics<parallel>, #tpu.dimension_semantics<parallel>], iteration_bounds = array<i64: 1, 1>, scalar_prefetch = 0 : i64, scratch_operands = 0 : i64, tpu.core_type = #tpu.core_type<tc>, window_params = [{transform_indices = @transform_0, window_bounds = array<i64: 1, 512>}, {transform_indices = @transform_1, window_bounds = array<i64: 1, 512>}, {transform_indices = @transform_2, window_bounds = array<i64: 8, 512>}, {transform_indices = @transform_3, window_bounds = array<i64: 8, 512>}, {transform_indices = @transform_4, window_bounds = array<i64: 8, 512>}]} {
    %c0 = arith.constant 0 : index
    %c0_0 = arith.constant 0 : index
    %0 = vector.load %arg4[%c0, %c0_0] : memref<8x512xf32, #tpu.memory_space<vmem>>, vector<8x512xf32>
    %c0_1 = arith.constant 0 : index
    %c0_2 = arith.constant 0 : index
    %1 = vector.load %arg2[%c0_1, %c0_2] : memref<1x512xf32, #tpu.memory_space<vmem>>, vector<1x512xf32>
    %2 = vector.broadcast %1 : vector<1x512xf32> to vector<8x512xf32>
    %3 = arith.mulf %0, %2 : vector<8x512xf32>
    %c0_3 = arith.constant 0 : index
    %c0_4 = arith.constant 0 : index
    %4 = vector.load %arg5[%c0_3, %c0_4] : memref<8x512xf32, #tpu.memory_space<vmem>>, vector<8x512xf32>
    %c0_5 = arith.constant 0 : index
    %c0_6 = arith.constant 0 : index
    %5 = vector.load %arg3[%c0_5, %c0_6] : memref<1x512xf32, #tpu.memory_space<vmem>>, vector<1x512xf32>
    %6 = vector.broadcast %5 : vector<1x512xf32> to vector<8x512xf32>
    %7 = arith.mulf %4, %6 : vector<8x512xf32>
    %8 = arith.addf %3, %7 : vector<8x512xf32>
    %c0_7 = arith.constant 0 : index
    %c0_8 = arith.constant 0 : index
    %9 = vector.load %arg6[%c0_7, %c0_8] : memref<8x512xf32, #tpu.memory_space<vmem>>, vector<8x512xf32>
    tpu.vector_store %arg6[%c0_7, %c0_8], %8 {strides = array<i32>} : memref<8x512xf32, #tpu.memory_space<vmem>>, vector<8x512xf32>,
    return
  }
  func.func @transform_0(%arg0: i32, %arg1: i32) -> (i32, i32) {
    %c0_i32 = arith.constant 0 : i32
    %c0_i32_0 = arith.constant 0 : i32
    return %c0_i32, %arg1 : i32, i32
  }
  func.func @transform_1(%arg0: i32, %arg1: i32) -> (i32, i32) {
    %c0_i32 = arith.constant 0 : i32
    %c0_i32_0 = arith.constant 0 : i32
    return %c0_i32, %arg1 : i32, i32
  }
  func.func @transform_2(%arg0: i32, %arg1: i32) -> (i32, i32) {
    %c0_i32 = arith.constant 0 : i32
    return %arg0, %arg1 : i32, i32
  }
  func.func @transform_3(%arg0: i32, %arg1: i32) -> (i32, i32) {
    %c0_i32 = arith.constant 0 : i32
    return %arg0, %arg1 : i32, i32
  }
  func.func @transform_4(%arg0: i32, %arg1: i32) -> (i32, i32) {
    %c0_i32 = arith.constant 0 : i32
    return %arg0, %arg1 : i32, i32
  }
}

</mosaic_0001>

<bundles_post_ra>
// kernel: tpu_custom_call.1
= control target key start
LH: loop header
LB: loop body
LE: loop exit
PB: predicated region body
PF: predicated region fallthrough
CT: control target
= control target key end

     0   :  { %9 = vsyncpa [#allocation3], 0  ;;  %s314_s0 = inlined_call_operand.hbm [shape: f32[1,512], index: 0, kind: input, shape index: {}]   ;;  %s315_s1 = inlined_call_operand.hbm [shape: f32[1,512], index: 1, kind: input, shape index: {}]   ;;  %s316_s2 = inlined_call_operand.hbm [shape: f32[8,512], index: 2, kind: input, shape index: {}]   ;;  %s317_s3 = inlined_call_operand.hbm [shape: f32[8,512], index: 3, kind: input, shape index: {}]   ;;  %s318_s4 = inlined_call_operand.hbm [shape: f32[8,512], index: 4, kind: output, shape index: {}]  }
   0x1   :  { %10 = vsyncpa [#allocation6], 0 }
   0x2   :  { %11 = vsyncpa [#allocation9], 0  ;;  %s29_s17 = sshll.u32 %s315_s1, 4  ;;  %s30_s17 = int_to_ptr.hbm [resolvable:$true] %s29_s17 }
   0x3   :  { %12 = vsyncpa [#allocation4], 0  ;;  %s269_s18 = smov [#allocation5]   ;;  %s18_s22 = sshll.u32 %s314_s0, 4  ;;  %s19_s22 = int_to_ptr.hbm [resolvable:$true] %s18_s22 }
   0x4   :  { %s31_s19 = sshll.u32 %s269_s18, 4  ;;  %s270_s23 = smov [#allocation2]   ;;  %s32_s19 = int_to_ptr.vmem [resolvable:$true] %s31_s19 }
   0x5   :  { %34 = dma.hbm_to_vmem [thread:$0]  %s30_s17, 64, %s32_s19, [#allocation6]  }
   0x6   :  { %s20_s24 = sshll.u32 %s270_s23, 4  ;;  %s40_s27 = sshll.u32 %s316_s2, 4  ;;  %s21_s24 = int_to_ptr.vmem [resolvable:$true] %s20_s24  ;;  %s41_s27 = int_to_ptr.hbm [resolvable:$true] %s40_s27 }
   0x7   :  { %23 = dma.hbm_to_vmem [thread:$0]  %s19_s22, 64, %s21_s24, [#allocation3]  }
   0x8   :  { %s51_s29 = sshll.u32 %s317_s3, 4  ;;  %s271_s30 = smov [#allocation7]   ;;  %s52_s29 = int_to_ptr.hbm [resolvable:$true] %s51_s29 }
   0x9   :  { %s42_s5 = sshll.u32 %s271_s30, 4  ;;  %s272_s0 = smov [#allocation8]   ;;  %s43_s5 = int_to_ptr.vmem [resolvable:$true] %s42_s5 }
   0xa   :  { %45 = dma.hbm_to_vmem [thread:$0]  %s41_s27, 512, %s43_s5, [#allocation6]  }
   0xb   :  { %s53_s6 = sshll.u32 %s272_s0, 4  ;;  %s54_s6 = int_to_ptr.vmem [resolvable:$true] %s53_s6 }
   0xc   :  { %56 = dma.hbm_to_vmem [thread:$0]  %s52_s29, 512, %s54_s6, [#allocation9]  }
   0xd   :  { %261 = dma.done.wait [#allocation3], 64  }
   0xe   :  { %262 = vsyncadd [#allocation3], 4294967232 }
   0xf   :  { %263 = dma.done.wait [#allocation6], 576  }
  0x10   :  { %264 = vsyncadd [#allocation6], 4294966720 }
  0x11   :  { %265 = dma.done.wait [#allocation9], 512  }
  0x12   :  { %266 = vsyncadd [#allocation9], 4294966784  ;;  %v73_v0 = vld [vmem:[#allocation7] sm:$0xff]  ;;  %v77_v1 = vld [vmem:[#allocation2] sm:$0xf]  ;;  %s273_s2 = smov [#allocation10]  }
  0x13   :  { %v91_v2 = vld [vmem:[#allocation8] sm:$0xff]  ;;  %v79_v3 = vperm.slane %v77_v1, 0  ;;  %v95_v4 = vld [vmem:[#allocation5] sm:$0xf]  ;;  %v74_v5 = vld [vmem:[#allocation7 + $0x8] sm:$0xff]  ;;  %v80_v6 = vperm.slane %v77_v1, 1 }
  0x14   :  { %v92_v7 = vld [vmem:[#allocation8 + $0x8] sm:$0xff]  ;;  %v97_v8 = vperm.slane %v95_v4, 0  ;;  %v98_v9 = vperm.slane %v95_v4, 1  ;;  %v75_v10 = vld [vmem:[#allocation7 + $0x10] sm:$0xff]  ;;  %v81_v11 = vperm.slane %v77_v1, 2  ;;  %v99_v13 = vperm.slane %v95_v4, 2 }
  0x15   :  { %v93_v12 = vld [vmem:[#allocation8 + $0x10] sm:$0xff]  ;;  %v87_v14 = vmul.f32 %v79_v3, %v73_v0  ;;  %v88_v15 = vmul.f32 %v80_v6, %v74_v5  ;;  %v76_v16 = vld [vmem:[#allocation7 + $0x18] sm:$0xff]  ;;  %v82_v17 = vperm.slane %v77_v1, 3  ;;  %v100_v19 = vperm.slane %v95_v4, 3  ;;  %s122_s3 = sshll.u32 %s273_s2, 4  ;;  %s124_s9 = sshll.u32 %s318_s4, 4  ;;  %s123_s3 = int_to_ptr.vmem [resolvable:$true] %s122_s3  ;;  %s125_s9 = int_to_ptr.hbm [resolvable:$true] %s124_s9 }
  0x16   :  { %v94_v18 = vld [vmem:[#allocation8 + $0x18] sm:$0xff]  ;;  %v105_v20 = vmul.f32 %v97_v8, %v91_v2  ;;  %v106_v21 = vmul.f32 %v98_v9, %v92_v7  ;;  %v89_v22 = vmul.f32 %v81_v11, %v75_v10  ;;  %v107_v23 = vmul.f32 %v99_v13, %v93_v12 }
  0x17   :  { %v90_v24 = vmul.f32 %v82_v17, %v76_v16  ;;  %v108_v25 = vmul.f32 %v100_v19, %v94_v18 }
  0x18   :  { %v109_v26 = vadd.f32 %v105_v20, %v87_v14  ;;  %v110_v27 = vadd.f32 %v106_v21, %v88_v15  ;;  %v111_v28 = vadd.f32 %v107_v23, %v89_v22 }
  0x19   :  { %v112_v29 = vadd.f32 %v108_v25, %v90_v24 }
  0x1a   :  { %113 = vst [vmem:[#allocation10] sm:$0xff] %v109_v26 }
  0x1b   :  { %114 = vst [vmem:[#allocation10 + $0x8] sm:$0xff] %v110_v27 }
  0x1c   :  { %115 = vst [vmem:[#allocation10 + $0x10] sm:$0xff] %v111_v28 }
  0x1d   :  { %116 = vst [vmem:[#allocation10 + $0x18] sm:$0xff] %v112_v29 }
  0x1e   :  { %127 = dma.vmem_to_hbm [thread:$0]  %s123_s3, 512, %s125_s9, [#allocation4]  }
  0x1f   :  { %267 = dma.done.wait [#allocation4], 512  }
  0x20   :  { %268 = vsyncadd [#allocation4], 4294966784 }
  0x21   :  { %132 = vsyncpa [#allocation3], 1 }
  0x22   :  { %133 = vsyncpa [#allocation6], 1 }
  0x23   :  { %134 = vsyncpa [#allocation9], 1 }
  0x24   :  { %135 = vsyncpa [#allocation4], 1 }

</bundles_post_ra>
